<compile_context>
chip_gen: v6e
topology: v6e:2x2x1
jax: 0.10.0
libtpu: 0.0.40
codegen_flags: <defaults>
</compile_context>

<pallas_src>
import jax
import jax.numpy as jnp
from jax.experimental import pallas as pl
from jax.experimental.pallas import tpu as pltpu


def _round_up(v, m):
    return ((v + m - 1) // m) * m


def _cdiv(a, b):
    return (a + b - 1) // b


def _pooler_kernel(x_ref, w_ref, b_ref, o_ref):
    # x_ref: [TILE_B, H]      CLS tokens (resident when the batch fits one tile)
    # w_ref: [H, TILE_N]      weight column block (resident across the inner b sweep)
    # b_ref: [1, TILE_N]      f32 bias slice
    # o_ref: [TILE_B, TILE_N]
    x = x_ref[...]
    if x.dtype != w_ref.dtype:           # trace-time branch; cheap VPU cast on a tiny tile
        x = x.astype(w_ref.dtype)
    y = jnp.dot(x, w_ref[...], preferred_element_type=jnp.float32)   # MXU, f32 accum
    y = y + b_ref[...]                                                # [1,TN] -> [TB,TN]
    o_ref[...] = jnp.tanh(y).astype(o_ref.dtype)


def prepare_pooler_params(weight, bias, *, weight_dtype=jnp.bfloat16):
    """One-time (model-load) prep: cast the weight to the compute dtype and pad
    the OUTPUT dim to a lane multiple.  The contraction (input) dim is left
    unpadded so the activation never needs hidden-dim padding.

    weight: [H_in, H_out] stored (in_features, out_features); bias: [H_out].
    Returns (w_prepared [H_in, H_out_pad], b_prepared [1, H_out_pad] f32).
    """
    H_in, H_out = weight.shape
    Ho_pad = _round_up(H_out, 128)
    w = weight.astype(weight_dtype)
    b = bias.astype(jnp.float32)
    if Ho_pad != H_out:
        w = jnp.pad(w, ((0, 0), (0, Ho_pad - H_out)))
        b = jnp.pad(b, (0, Ho_pad - H_out))
    return w, b.reshape(1, Ho_pad)


def bert_pooler(hidden_states, weight, bias):
    """BertPooler forward.

    hidden_states: [B, S, H].
    weight / bias: preferably the outputs of prepare_pooler_params() (hoisted,
    bf16 by default).  Raw [H, H] / [H] params are also accepted and prepared
    per call (convenience / testing only).

    Returns [B, H] in hidden_states.dtype.
    """
    B, S, H = hidden_states.shape
    out_dtype = hidden_states.dtype

    if bias.ndim == 1:
        # Raw params -> prepare here.  Prefer calling prepare_pooler_params()
        # once at model-load time instead (avoids a per-call weight cast/pad).
        weight, bias = prepare_pooler_params(weight, bias)
    H_in, H_pad = weight.shape
    assert H_in == H, "weight input dim must match hidden size"

    # CLS token slice (small strided copy; see TODO(synk) above).
    x = hidden_states[:, 0, :]                                  # [B, H]

    x_bytes = jnp.dtype(x.dtype).itemsize
    w_bytes = jnp.dtype(weight.dtype).itemsize
    o_bytes = jnp.dtype(out_dtype).itemsize

    # Sublane packing multiple for the narrowest on-chip operand dtype.
    sub_mult = {4: 8, 2: 16, 1: 32}.get(min(x_bytes, w_bytes, o_bytes), 8)

    # Output-column tile: lane-dense, and small enough that BERT-class H gives
    # each v7x TensorCore >= 2 grid steps along the megacore-sharded axis.
    TILE_N = min(H_pad, 256)

    # Batch tile: whole batch in one tile whenever the VMEM budget allows (the
    # weight then streams exactly once and x stays resident); otherwise split
    # into near-equal tiles to avoid ~2x batch padding.
    def footprint(tile_b):
        return 2 * (tile_b * H * x_bytes          # x (double-buffered)
                    + H * TILE_N * w_bytes        # weight column block
                    + tile_b * TILE_N * o_bytes   # output tile
                    + 8 * TILE_N * 4)             # bias (sublane-padded)

    VMEM_BUDGET = 24 * 1024 * 1024
    max_tile_b = 1024
    while max_tile_b > sub_mult and footprint(max_tile_b) > VMEM_BUDGET:
        max_tile_b //= 2
    max_tile_b = max(max_tile_b, sub_mult)

    n_b = _cdiv(B, max_tile_b)
    TILE_B = _round_up(_cdiv(B, n_b), sub_mult)
    B_pad = n_b * TILE_B
    if B_pad != B:
        x = jnp.pad(x, ((0, B_pad - B), (0, 0)))

    # Explicit scoped-VMEM budget (the 16 MiB v5e default is too small for
    # large H at f32); generous headroom, well under v7x's 64 MiB physical.
    est = footprint(TILE_B)
    vmem_limit = int(min(max(2 * est, 32 * 2**20), 48 * 2**20))

    grid = (H_pad // TILE_N, B_pad // TILE_B)     # (n outer, b inner)

    cost = pl.CostEstimate(
        flops=2 * B_pad * H * H_pad,
        transcendentals=B_pad * H_pad,
        bytes_accessed=(H * H_pad * w_bytes        # weight, read once
                        + B_pad * H * x_bytes      # CLS activations
                        + H_pad * 4                # bias
                        + B_pad * H_pad * o_bytes  # output
                        ),
    )

    out = pl.pallas_call(
        _pooler_kernel,
        out_shape=jax.ShapeDtypeStruct((B_pad, H_pad), out_dtype),
        grid_spec=pltpu.PrefetchScalarGridSpec(
            num_scalar_prefetch=0,
            grid=grid,
            in_specs=[
                # x tile: indexed only by the inner batch axis -> resident when
                # the batch fits one tile; otherwise the small operand streams.
                pl.BlockSpec((TILE_B, H), lambda n, b: (b, 0)),
                # Weight column block: indexed by the OUTER axis -> read from
                # HBM exactly once and held resident across the inner b sweep.
                pl.BlockSpec((H, TILE_N), lambda n, b: (0, n)),
                pl.BlockSpec((1, TILE_N), lambda n, b: (0, n)),
            ],
            out_specs=pl.BlockSpec((TILE_B, TILE_N), lambda n, b: (b, n)),
        ),
        compiler_params=pltpu.CompilerParams(
            # No reduction grid axis (K is carried whole in each block) -> both
            # axes independent; megacore shards the outer (N) axis on v7x.
            dimension_semantics=("parallel", "parallel"),
            vmem_limit_bytes=vmem_limit,
        ),
        cost_estimate=cost,
    )(x, weight, bias)

    return out[:B, :H]


if __name__ == "__main__":
    B, S, H = 2, 8, 32  # batch, seq, hidden_size
    key = jax.random.PRNGKey(0)
    k_x, k_w, k_b = jax.random.split(key, 3)

    hidden_states = jax.random.normal(k_x, (B, S, H), dtype=jnp.float32)
    # nn.Linear-style uniform(-1/sqrt(H), 1/sqrt(H)) init; weight kept as
    # [in, out] so the kernel computes x @ W + b (== PyTorch x @ W_t.T + b).
    bound = 1.0 / (H ** 0.5)
    weight = jax.random.uniform(k_w, (H, H), minval=-bound, maxval=bound,
                                dtype=jnp.float32)
    bias = jax.random.uniform(k_b, (H,), minval=-bound, maxval=bound,
                              dtype=jnp.float32)

    ref = jnp.tanh(hidden_states[:, 0] @ weight + bias)

    # Recommended path: bf16 weights prepared once at "model load" time.
    w_bf16, b_prep = prepare_pooler_params(weight, bias)           # default bf16
    out_bf16 = jax.block_until_ready(bert_pooler(hidden_states, w_bf16, b_prep))
    assert out_bf16.shape == (B, H)
    assert jnp.allclose(out_bf16, ref, atol=5e-2, rtol=5e-2)

    # Full-precision path (prepared f32 weights): tight match to the reference.
    w_f32, b_f32 = prepare_pooler_params(weight, bias, weight_dtype=jnp.float32)
    out_f32 = jax.block_until_ready(bert_pooler(hidden_states, w_f32, b_f32))
    assert out_f32.shape == (B, H)
    assert jnp.allclose(out_f32, ref, atol=1e-5, rtol=1e-5)

    # Convenience path: raw (unprepared) params still accepted.
    out_raw = jax.block_until_ready(bert_pooler(hidden_states, weight, bias))
    assert out_raw.shape == (B, H)
    assert jnp.allclose(out_raw, ref, atol=5e-2, rtol=5e-2)

    print("KERNEL_OK")
</pallas_src>

<mosaic_0001>
module attributes {stable_mosaic.version = 11 : i64} {
  func.func @_pooler_kernel(%arg0: i32, %arg1: i32, %arg2: memref<16x32xf32, #tpu.memory_space<vmem>>, %arg3: memref<32x128xbf16, #tpu.memory_space<vmem>>, %arg4: memref<1x128xf32, #tpu.memory_space<vmem>>, %arg5: memref<16x128xf32, #tpu.memory_space<vmem>>) attributes {dimension_semantics = [#tpu.dimension_semantics<parallel>, #tpu.dimension_semantics<parallel>], iteration_bounds = array<i64: 1, 1>, scalar_prefetch = 0 : i64, scratch_operands = 0 : i64, tpu.core_type = #tpu.core_type<tc>, window_params = [{transform_indices = @transform_0, window_bounds = array<i64: 16, 32>}, {transform_indices = @transform_1, window_bounds = array<i64: 32, 128>}, {transform_indices = @transform_2, window_bounds = array<i64: 1, 128>}, {transform_indices = @transform_3, window_bounds = array<i64: 16, 128>}]} {
    %c0 = arith.constant 0 : index
    %c0_0 = arith.constant 0 : index
    %0 = vector.load %arg2[%c0, %c0_0] : memref<16x32xf32, #tpu.memory_space<vmem>>, vector<16x32xf32>
    %1 = arith.truncf %0 : vector<16x32xf32> to vector<16x32xbf16>
    %c0_1 = arith.constant 0 : index
    %c0_2 = arith.constant 0 : index
    %2 = vector.load %arg3[%c0_1, %c0_2] : memref<32x128xbf16, #tpu.memory_space<vmem>>, vector<32x128xbf16>
    %cst = arith.constant dense<0.000000e+00> : vector<16x128xf32>
    %3 = tpu.matmul %1, %2, %cst {dimension_numbers = #tpu.dot_dimension_numbers<[1], [0], [0], [1], [0, 0, 1, 1], [], []>} : vector<16x32xbf16>, vector<32x128xbf16>, vector<16x128xf32> -> vector<16x128xf32>
    %c0_3 = arith.constant 0 : index
    %c0_4 = arith.constant 0 : index
    %4 = vector.load %arg4[%c0_3, %c0_4] : memref<1x128xf32, #tpu.memory_space<vmem>>, vector<1x128xf32>
    %5 = vector.broadcast %4 : vector<1x128xf32> to vector<16x128xf32>
    %6 = arith.addf %3, %5 : vector<16x128xf32>
    %7 = math.tanh %6 : vector<16x128xf32>
    %c0_5 = arith.constant 0 : index
    %c0_6 = arith.constant 0 : index
    %8 = vector.load %arg5[%c0_5, %c0_6] : memref<16x128xf32, #tpu.memory_space<vmem>>, vector<16x128xf32>
    tpu.vector_store %arg5[%c0_5, %c0_6], %7 {strides = array<i32>} : memref<16x128xf32, #tpu.memory_space<vmem>>, vector<16x128xf32>,
    return
  }
  func.func @transform_0(%arg0: i32, %arg1: i32) -> (i32, i32) {
    %c0_i32 = arith.constant 0 : i32
    %c0_i32_0 = arith.constant 0 : i32
    return %arg1, %c0_i32 : i32, i32
  }
  func.func @transform_1(%arg0: i32, %arg1: i32) -> (i32, i32) {
    %c0_i32 = arith.constant 0 : i32
    %c0_i32_0 = arith.constant 0 : i32
    return %c0_i32, %arg0 : i32, i32
  }
  func.func @transform_2(%arg0: i32, %arg1: i32) -> (i32, i32) {
    %c0_i32 = arith.constant 0 : i32
    %c0_i32_0 = arith.constant 0 : i32
    return %c0_i32, %arg0 : i32, i32
  }
  func.func @transform_3(%arg0: i32, %arg1: i32) -> (i32, i32) {
    %c0_i32 = arith.constant 0 : i32
    return %arg1, %arg0 : i32, i32
  }
}

</mosaic_0001>

<bundles_post_ra>
// kernel: tpu_custom_call.1
= control target key start
LH: loop header
LB: loop body
LE: loop exit
PB: predicated region body
PF: predicated region fallthrough
CT: control target
= control target key end

     0   :  { %8 = vsyncpa [#allocation3], 0  ;;  %s280_s0 = inlined_call_operand.hbm [shape: f32[16,32], index: 0, kind: input, shape index: {}]   ;;  %s281_s1 = inlined_call_operand.hbm [shape: bf16[32,128], index: 1, kind: input, shape index: {}]   ;;  %s282_s2 = inlined_call_operand.vmem [shape: f32[1,128], index: 2, kind: input, shape index: {}]   ;;  %s283_s3 = inlined_call_operand.hbm [shape: f32[16,128], index: 3, kind: output, shape index: {}]  }
   0x1   :  { %9 = vsyncpa [#allocation6], 0 }
   0x2   :  { %10 = vsyncpa [#allocation4], 0  ;;  %s233_s12 = smov [#allocation2]  }
   0x3   :  { %s16_s13 = sshll.u32 %s233_s12, 4  ;;  %s17_s13 = int_to_ptr.vmem [resolvable:$true] %s16_s13 }
   0x4   :  { %s175_s14 = scalar_lea.vmem %s17_s13, 256  ;;  %p180_p1 = scmp.lt.s32.totalorder %s17_s13, %s17_s13 }
   0x5   :  { %p176_p0 = scmp.ne.s32.totalorder %s17_s13, %s175_s14  ;;  %p181_p2 = scmp.lt.s32.totalorder %s175_s14, %s175_s14 }
   0x7   :  { %p182_p3 = por %p181_p2, %p180_p1 }
   0x9   :  { %p183_p4 = pnand %p182_p3, %p176_p0 }
   0xb   :  { %186 = shalt.err (!%p183_p4)
}
   0xc   :  { %s234_s15 = smov 128   ;;  %s235_s16 = smov 8  }
   0xd   :  { %22 = dma.hbm_to_vmem [thread:$0]  %s280_s0, 256, %s17_s13, [#allocation3], %s234_s15, %s234_s15, %s235_s16  }
   0xe   :  { %s236_s19 = smov [#allocation5]  }
   0xf   :  { %s28_s20 = sshll.u32 %s236_s19, 4  ;;  %s29_s20 = int_to_ptr.vmem [resolvable:$true] %s28_s20 }
  0x10   :  { %s195_s21 = scalar_lea.vmem %s29_s20, 256  ;;  %p200_p6 = scmp.lt.s32.totalorder %s29_s20, %s29_s20 }
  0x11   :  { %p196_p5 = scmp.ne.s32.totalorder %s29_s20, %s195_s21  ;;  %p201_p7 = scmp.lt.s32.totalorder %s195_s21, %s195_s21 }
  0x13   :  { %p202_p8 = por %p201_p7, %p200_p6 }
  0x15   :  { %p203_p9 = pnand %p202_p8, %p196_p5 }
  0x17   :  { %206 = shalt.err (!%p203_p9)
}
  0x18   :  { %s237_s22 = smov 64   ;;  %s238_s23 = smov 4  }
  0x19   :  { %34 = dma.hbm_to_vmem [thread:$0]  %s281_s1, 256, %s29_s20, [#allocation6], %s237_s22, %s237_s22, %s238_s23  }
  0x1a   :  { %227 = dma.done.wait [#allocation3], 256  }
  0x1b   :  { %228 = vsyncadd [#allocation3], 4294967040 }
  0x1c   :  { %229 = dma.done.wait [#allocation6], 256  }
  0x1d   :  { %230 = vsyncadd [#allocation6], 4294967040  ;;  %v239_v0 = vmov 0.0   ;;  %vm240_vm0 = vmmov 0   ;;  %v161_v1 = vld [vmem:[#allocation5 + $0x8] sm:$0xff]   ;;  %v162_v2 = vld [vmem:[#allocation5] sm:$0xff]  }
  0x1e   :  { %144 = vmatprep.subr.bf16.mxu0 %v239_v0  ;;  %148 = vmatprep.mubr.msk.bf16.mxu0 %vm240_vm0, %v239_v0  ;;  %v44_v3 = vld [vmem:[#allocation2] sm:$0xff]  ;;  %v45_v4 = vld [vmem:[#allocation2 + $0x8] sm:$0xff]  ;;  %vm70_vm1 = vcmask 261120   ;;  %s241_s26 = smov [#allocation7]  }
  0x1f   :  { %145 = vmatpush3.bf16.msra.mxu0 %v161_v1  ;;  %v46_v5 = vpack.c.bf16 %v45_v4, %v44_v3  ;;  %v137_v6 = vld [vmem:[%s282_s2] ss:$0 sm:$0xff]  ;;  %s124_s27 = sshll.u32 %s241_s26, 4  ;;  %s125_s27 = int_to_ptr.vmem [resolvable:$true] %s124_s27 }
  0x20   :  { %146 = vmatprep.subr.bf16.mxu0 %v239_v0  ;;  %s207_s28 = scalar_lea.vmem %s125_s27, 256  ;;  %p212_p11 = scmp.lt.s32.totalorder %s125_s27, %s125_s27 }
  0x21   :  { %p208_p10 = scmp.ne.s32.totalorder %s125_s27, %s207_s28  ;;  %p213_p12 = scmp.lt.s32.totalorder %s207_s28, %s207_s28 }
  0x23   :  { %147 = vmatpush3.bf16.msra.mxu0 %v162_v2  ;;  %p214_p13 = por %p213_p12, %p212_p11 }
  0x25   :  { %p215_p0 = pnand %p214_p13, %p208_p10 }
  0x26   :  { %149 = vmatmul.mubr.msk.bf16.vlgmr.msra.gmra.mxu0 %vm70_vm1, %v46_v5 }
  0xe6   :  { %v108_v7 = vpop.f32.mrf.mxu0 }
  0xe7   :  { %v109_v8 = vadd.f32 %v137_v6, %v108_v7 }
  0xe8   :  { %v150_v9 = vpop.f32.mrf.mxu0 }
  0xe9   :  { %163 = vtanh.f32 %v109_v8 }
  0xea   :  { %v111_v10 = vpop.f32.mrf.mxu0 }
  0xeb   :  { %v112_v11 = vadd.f32 %v137_v6, %v111_v10 }
  0xec   :  { %v151_v12 = vpop.f32.mrf.mxu0 }
  0xed   :  { %165 = vtanh.f32 %v112_v11 }
  0xf6   :  { %v164_v13 = vpop.eup %163 }
  0xf7   :  { %117 = vst [vmem:[#allocation7] sm:$0xff] %v164_v13 }
  0xfa   :  { %v166_v14 = vpop.eup %165 }
  0xfb   :  { %118 = vst [vmem:[#allocation7 + $0x8] sm:$0xff] %v166_v14 }
  0xfc   :  { %218 = shalt.err (!%p215_p0)
}
  0xfd   :  { %130 = dma.vmem_to_hbm [thread:$0]  %s125_s27, 256, %s283_s3, [#allocation4], %s234_s15, %s234_s15, %s235_s16  }
  0xfe   :  { %231 = dma.done.wait [#allocation4], 256  }
  0xff   :  { %232 = vsyncadd [#allocation4], 4294967040 }
 0x100   :  { %134 = vsyncpa [#allocation3], 1 }
 0x101   :  { %135 = vsyncpa [#allocation6], 1 }
 0x102   :  { %136 = vsyncpa [#allocation4], 1 }

</bundles_post_ra>
